<compile_context>
chip_gen: v7x
topology: tpu7x:2x2x1
jax: 0.10.0
libtpu: 0.0.40
codegen_flags: <defaults>
</compile_context>

<pallas_src>
import functools

import jax
import jax.numpy as jnp
from jax import lax
from jax.experimental import pallas as pl
from jax.experimental.pallas import tpu as pltpu


def _label_smooth_ce_kernel(logits_ref, labels_ref, out_ref, *, epsilon, num_classes, batch):
    i = pl.program_id(0)

    x = logits_ref[...]                                   # (TB, C) native dtype
    labels = labels_ref[...]                              # (TB, 1) int32
    tb = x.shape[0]

    # Row max in the native dtype (exact for bf16); upcast to f32 only inside
    # the transcendental / accumulating ops so no full f32 copy stays live.
    m = jnp.max(x, axis=1, keepdims=True)                 # (TB, 1)
    mf = m.astype(jnp.float32)
    sumexp = jnp.sum(jnp.exp(x.astype(jnp.float32) - mf), axis=1, keepdims=True)
    lse = mf + jnp.log(sumexp)                            # (TB, 1) f32

    # One fused weighted reduction replaces separate x[b, y] and sum_c x[b, c]:
    #   t_dot_x = sum_c [ eps/C + (1-eps)*(c == y_b) ] * x[b, c]
    col = lax.broadcasted_iota(jnp.int32, x.shape, 1)     # (TB, C)
    w = jnp.where(col == labels,
                  1.0 - epsilon + epsilon / num_classes,
                  epsilon / num_classes)
    t_dot_x = jnp.sum(w * x.astype(jnp.float32), axis=1, keepdims=True)

    loss_row = lse - t_dot_x                              # (TB, 1) f32

    # Mask rows past the true batch (ragged last tile). Only the final loss is
    # masked: garbage rows only pollute their own row and select does not
    # propagate NaN/Inf from the unselected branch.
    row = lax.broadcasted_iota(jnp.int32, (tb, 1), 0) + i * tb
    loss_row = jnp.where(row < batch, loss_row, 0.0)

    # Per-tile partial sum, stored in lane 0 of an unmasked (1, 128) block.
    tile_sum = jnp.sum(loss_row, axis=0, keepdims=True)   # (1, 1) f32
    lane = lax.broadcasted_iota(jnp.int32, (1, 128), 1)
    out_ref[...] = jnp.where(lane == 0, tile_sum, 0.0)


def _vmem_capacity_bytes():
    try:
        return int(pltpu.get_tpu_info().vmem_capacity_bytes)
    except Exception:
        return 64 * 1024 * 1024   # conservative fallback (v7x-sized VMEM)


def _choose_tile_rows(batch, num_classes, itemsize):
    """Byte-based tile sizing (no hard row cap), generation-aware VMEM budget."""
    cap = _vmem_capacity_bytes()
    vmem_limit = min(cap // 2, 64 * 1024 * 1024)   # 64 MiB on v5e/v6e, 32 MiB on v7x
    usable = (vmem_limit * 3) // 4                 # headroom for compiler scratch

    # Per-row VMEM cost: double-buffered native-dtype input tile plus roughly
    # two tile-sized f32 temporaries (exp output, weighted product).
    per_row = 2 * num_classes * itemsize + 2 * num_classes * 4
    rows = max(8, usable // per_row)

    # v7x megacore: guarantee >= 2 grid steps whenever the batch allows, so the
    # "parallel" batch axis can be sharded across both TensorCores.
    if batch > 8:
        half = max(8, (((batch + 1) // 2) // 8) * 8)
        rows = min(rows, half)

    rows = max(8, (rows // 8) * 8)                 # sublane alignment
    if rows >= batch:
        rows = batch                               # single full-extent tile (tiny batch)
    return rows, vmem_limit


def cross_entropy_label_smooth(inputs, targets, *, num_classes, epsilon, tile_rows=None):
    """inputs: (B, C) float logits (f32 or bf16); targets: (B,) ints -> scalar f32."""
    B, C = inputs.shape
    assert C == num_classes
    labels2d = targets.astype(jnp.int32).reshape(B, 1)

    itemsize = inputs.dtype.itemsize
    auto_tb, vmem_limit = _choose_tile_rows(B, C, itemsize)
    tb = auto_tb if tile_rows is None else int(tile_rows)
    num_tiles = pl.cdiv(B, tb)

    kernel = functools.partial(
        _label_smooth_ce_kernel,
        epsilon=float(epsilon),
        num_classes=int(num_classes),
        batch=int(B),
    )

    partials = pl.pallas_call(
        kernel,
        out_shape=jax.ShapeDtypeStruct((1, num_tiles * 128), jnp.float32),
        grid=(num_tiles,),
        in_specs=[
            pl.BlockSpec((tb, C), lambda i: (i, 0)),     # pipelined logits tiles
            pl.BlockSpec((tb, 1), lambda i: (i, 0)),     # matching label tiles
        ],
        out_specs=pl.BlockSpec((1, 128), lambda i: (0, i)),  # lane-dense per-tile sums
        compiler_params=pltpu.CompilerParams(
            dimension_semantics=("parallel",),           # megacore-friendly (v7x)
            vmem_limit_bytes=int(vmem_limit),
        ),
        cost_estimate=pl.CostEstimate(
            flops=8 * B * C,
            transcendentals=B * C,
            bytes_accessed=B * C * itemsize + B * 4 + num_tiles * 128 * 4,
        ),
    )(inputs, labels2d)

    # (-t * log_probs).mean(0).sum() == (sum of per-row losses) / B.
    # Padded rows and non-zero lanes were written as exact 0, so the full sum
    # is correct; divide by the GLOBAL batch size exactly once.
    return jnp.sum(partials) / B


def _reference(inputs, targets, num_classes, epsilon):
    log_probs = jax.nn.log_softmax(inputs.astype(jnp.float32), axis=1)
    onehot = jax.nn.one_hot(targets, num_classes, dtype=jnp.float32)
    smoothed = (1.0 - epsilon) * onehot + epsilon / num_classes
    return jnp.sum(jnp.mean(-smoothed * log_probs, axis=0))


if __name__ == "__main__":
    key = jax.random.PRNGKey(0)
    k1, k2, k3, k4 = jax.random.split(key, 4)

    num_classes = 32
    epsilon = 0.1

    # Case 1: small single-tile problem, f32 logits (matches PyTorch (N, C)).
    b1 = 8
    logits1 = jax.random.normal(k1, (b1, num_classes), dtype=jnp.float32)
    labels1 = jax.random.randint(k2, (b1,), 0, num_classes, dtype=jnp.int32)
    loss1 = jax.block_until_ready(
        cross_entropy_label_smooth(
            logits1, labels1, num_classes=num_classes, epsilon=epsilon
        )
    )
    ref1 = _reference(logits1, labels1, num_classes, epsilon)
    assert jnp.allclose(loss1, ref1, atol=1e-5, rtol=1e-5), (loss1, ref1)

    # Case 2: multi-tile grid with a ragged last tile (exercises masking) and
    # bf16 logits (exercises the in-kernel upcast path).
    b2 = 20
    logits2 = jax.random.normal(k3, (b2, num_classes), dtype=jnp.bfloat16)
    labels2 = jax.random.randint(k4, (b2,), 0, num_classes, dtype=jnp.int32)
    loss2 = jax.block_until_ready(
        cross_entropy_label_smooth(
            logits2, labels2, num_classes=num_classes, epsilon=epsilon, tile_rows=8
        )
    )
    ref2 = _reference(logits2.astype(jnp.float32), labels2, num_classes, epsilon)
    assert jnp.allclose(loss2, ref2, atol=5e-2, rtol=5e-2), (loss2, ref2)

    print("KERNEL_OK")
</pallas_src>

<mosaic_0001>
module attributes {stable_mosaic.version = 11 : i64} {
  func.func @_label_smooth_ce_kernel(%arg0: i32, %arg1: memref<8x32xf32, #tpu.memory_space<vmem>>, %arg2: memref<8x1xi32, #tpu.memory_space<vmem>>, %arg3: memref<1x128xf32, #tpu.memory_space<vmem>>) attributes {dimension_semantics = [#tpu.dimension_semantics<parallel>], iteration_bounds = array<i64: 1>, scalar_prefetch = 0 : i64, scratch_operands = 0 : i64, tpu.core_type = #tpu.core_type<tc>, window_params = [{transform_indices = @transform_0, window_bounds = array<i64: 8, 32>}, {transform_indices = @transform_1, window_bounds = array<i64: 8, 1>}, {transform_indices = @transform_2, window_bounds = array<i64: 1, 128>}]} {
    %c0 = arith.constant 0 : index
    %c0_0 = arith.constant 0 : index
    %0 = vector.load %arg1[%c0, %c0_0] : memref<8x32xf32, #tpu.memory_space<vmem>>, vector<8x32xf32>
    %c0_1 = arith.constant 0 : index
    %c0_2 = arith.constant 0 : index
    %1 = vector.load %arg2[%c0_1, %c0_2] : memref<8x1xi32, #tpu.memory_space<vmem>>, vector<8x1xi32>
    %cst = arith.constant dense<0xFF800000> : vector<8xf32>
    %2 = vector.multi_reduction <maximumf>, %0, %cst [1] : vector<8x32xf32> to vector<8xf32>
    %3 = vector.shape_cast %2 : vector<8xf32> to vector<8x1xf32>
    %4 = vector.broadcast %3 : vector<8x1xf32> to vector<8x32xf32>
    %5 = arith.subf %0, %4 : vector<8x32xf32>
    %6 = math.exp %5 : vector<8x32xf32>
    %cst_3 = arith.constant dense<0.000000e+00> : vector<8xf32>
    %7 = vector.multi_reduction <add>, %6, %cst_3 [1] : vector<8x32xf32> to vector<8xf32>
    %8 = vector.shape_cast %7 : vector<8xf32> to vector<8x1xf32>
    %9 = math.log %8 : vector<8x1xf32>
    %10 = arith.addf %3, %9 : vector<8x1xf32>
    %11 = tpu.iota {dimensions = array<i32: 1>} : vector<8x32xi32>
    %12 = vector.broadcast %1 : vector<8x1xi32> to vector<8x32xi32>
    %13 = arith.cmpi eq, %11, %12 : vector<8x32xi32>
    %cst_4 = arith.constant 0.903124988 : f32
    %cst_5 = arith.constant 3.125000e-03 : f32
    %14 = vector.broadcast %cst_4 : f32 to vector<8x32xf32>
    %15 = vector.broadcast %cst_5 : f32 to vector<8x32xf32>
    %16 = arith.select %13, %14, %15 : vector<8x32xi1>, vector<8x32xf32>
    %17 = arith.mulf %16, %0 : vector<8x32xf32>
    %cst_6 = arith.constant dense<0.000000e+00> : vector<8xf32>
    %18 = vector.multi_reduction <add>, %17, %cst_6 [1] : vector<8x32xf32> to vector<8xf32>
    %19 = vector.shape_cast %18 : vector<8xf32> to vector<8x1xf32>
    %20 = arith.subf %10, %19 : vector<8x1xf32>
    %21 = tpu.iota {dimensions = array<i32: 0>} : vector<8x1xi32>
    %c8_i32 = arith.constant 8 : i32
    %22 = arith.muli %arg0, %c8_i32 : i32
    %23 = vector.broadcast %22 : i32 to vector<8x1xi32>
    %24 = arith.addi %21, %23 : vector<8x1xi32>
    %c8_i32_7 = arith.constant 8 : i32
    %25 = vector.broadcast %c8_i32_7 : i32 to vector<8x1xi32>
    %26 = arith.cmpi slt, %24, %25 : vector<8x1xi32>
    %cst_8 = arith.constant 0.000000e+00 : f32
    %27 = vector.broadcast %cst_8 : f32 to vector<8x1xf32>
    %28 = arith.select %26, %20, %27 : vector<8x1xi1>, vector<8x1xf32>
    %cst_9 = arith.constant dense<0.000000e+00> : vector<1xf32>
    %29 = vector.multi_reduction <add>, %28, %cst_9 [0] : vector<8x1xf32> to vector<1xf32>
    %30 = vector.shape_cast %29 : vector<1xf32> to vector<1x1xf32>
    %31 = tpu.iota {dimensions = array<i32: 1>} : vector<1x128xi32>
    %c0_i32 = arith.constant 0 : i32
    %32 = vector.broadcast %c0_i32 : i32 to vector<1x128xi32>
    %33 = arith.cmpi eq, %31, %32 : vector<1x128xi32>
    %cst_10 = arith.constant 0.000000e+00 : f32
    %34 = vector.shape_cast %30 : vector<1x1xf32> to vector<1x1xf32>
    %35 = vector.broadcast %34 : vector<1x1xf32> to vector<1x128xf32>
    %36 = vector.broadcast %cst_10 : f32 to vector<1x128xf32>
    %37 = arith.select %33, %35, %36 : vector<1x128xi1>, vector<1x128xf32>
    %c0_11 = arith.constant 0 : index
    %c0_12 = arith.constant 0 : index
    %38 = vector.load %arg3[%c0_11, %c0_12] : memref<1x128xf32, #tpu.memory_space<vmem>>, vector<1x128xf32>
    tpu.vector_store %arg3[%c0_11, %c0_12], %37 {strides = array<i32>} : memref<1x128xf32, #tpu.memory_space<vmem>>, vector<1x128xf32>,
    return
  }
  func.func @transform_0(%arg0: i32) -> (i32, i32) {
    %c0_i32 = arith.constant 0 : i32
    %c0_i32_0 = arith.constant 0 : i32
    return %arg0, %c0_i32 : i32, i32
  }
  func.func @transform_1(%arg0: i32) -> (i32, i32) {
    %c0_i32 = arith.constant 0 : i32
    %c0_i32_0 = arith.constant 0 : i32
    return %arg0, %c0_i32 : i32, i32
  }
  func.func @transform_2(%arg0: i32) -> (i32, i32) {
    %c0_i32 = arith.constant 0 : i32
    %c0_i32_0 = arith.constant 0 : i32
    return %c0_i32, %arg0 : i32, i32
  }
}

</mosaic_0001>

<bundles_post_ra>
// kernel: tpu_custom_call.1
= control target key start
LH: loop header
LB: loop body
LE: loop exit
PB: predicated region body
PF: predicated region fallthrough
CT: control target
= control target key end

     0   :  { %vm14_vm0 = vcmask 261120   ;;  %s140_s0 = inlined_call_operand.vmem [shape: f32[8,32], index: 0, kind: input, shape index: {}]   ;;  %s141_s1 = inlined_call_operand.vmem [shape: s32[8,1], index: 1, kind: input, shape index: {}]   ;;  %s142_s2 = inlined_call_operand.hbm [shape: f32[1,128], index: 2, kind: output, shape index: {}]  }
   0x1   :  { %v12_v0 = vld [vmem:[%s140_s0] sm:$0xff] }
   0x2   :  { %7 = vsyncpa [#allocation3], 0  ;;  %v15_v1 = vsel %vm14_vm0, %v12_v0, -inf  ;;  %v101_v2 = vmov 0   ;;  %v13_v3 = vld [vmem:[%s141_s1] sm:$0xff]  ;;  %v27_v6 = vlaneseq  ;;  %s103_s0 = smov [#allocation2]  }
   0x3   :  { %72 = vset.pattern.permute.xlu0 %v101_v2  ;;  %v102_v10 = vmov 0.003125   ;;  %s61_s1 = sshll.u32 %s103_s0, 4  ;;  %s62_s1 = int_to_ptr.vmem [resolvable:$true] %s61_s1 }
   0x4   :  { %16 = vmax.xlane.f32.xlu0 %v15_v1  ;;  %v28_v8 = vand.u32 127, %v27_v6  ;;  %s77_s13 = scalar_lea.vmem %s62_s1, 16  ;;  %s81_s14 = scalar_lea.vmem %s62_s1, 32 }
   0x5   :  { %p78_p0 = scmp.ne.s32.totalorder %s62_s1, %s77_s13  ;;  %p82_p1 = scmp.lt.s32.totalorder %s62_s1, %s62_s1 }
   0x6   :  { %vm52_vm2 = vcmp.eq.s32.totalorder %v28_v8, 0  ;;  %p83_p2 = scmp.lt.s32.totalorder %s81_s14, %s77_s13 }
   0x8   :  { %p84_p3 = por %p83_p2, %p82_p1 }
   0xa   :  { %p85_p4 = pnand %p84_p3, %p78_p0 }
  0x1a   :  { %30 = vperm.xlu0 %72, %v13_v3  }
  0x91   :  { %v17_v4 = vpop.xlane.xlu0 %16 }
  0x92   :  { %v18_v5 = vsub.f32 %v12_v0, %v17_v4 }
  0x94   :  { %v19_v7 = vmul.f32 1.442695, %v18_v5 }
  0x96   :  { %73 = vpow2.f32 %v19_v7 }
  0x99   :  { %v31_v9 = vpop.permute.xlu0 %30 }
  0x9a   :  { %vm32_vm1 = vcmp.eq.s32.totalorder %v28_v8, %v31_v9 }
  0x9b   :  { %v33_v11 = vsel %vm32_vm1, 0.903125, %v102_v10 }
  0x9c   :  { %v34_v12 = vmul.f32 %v33_v11, %v12_v0 }
  0x9e   :  { %v35_v15 = vsel %vm14_vm0, %v34_v12, 0.0 }
  0xa0   :  { %v74_v13 = vpop.eup %73 }
  0xa1   :  { %v21_v14 = vsel %vm14_vm0, %v74_v13, 0.0 }
  0xa2   :  { %22 = vadd.xlane.f32.xlu1 %v21_v14 }
  0xa6   :  { %36 = vadd.xlane.f32.xlu1 %v35_v15 }
 0x12f   :  { %v23_v16 = vpop.xlane.xlu1 %22 }
 0x130   :  { %75 = vlog2.f32 %v23_v16 }
 0x133   :  { %v37_v19 = vpop.xlane.xlu1 %36 }
 0x13a   :  { %v76_v17 = vpop.eup %75 }
 0x13b   :  { %v25_v18 = vmul.f32 0.6931472, %v76_v17 }
 0x13d   :  { %v26_v20 = vadd.f32 %v25_v18, %v17_v4 }
 0x13f   :  { %v38_v21 = vsub.f32 %v26_v20, %v37_v19 }
 0x141   :  { %v46_v22 = vrot.slane %v38_v21, 4 }
 0x143   :  { %v47_v23 = vadd.f32 %v46_v22, %v38_v21 }
 0x145   :  { %v48_v24 = vrot.slane %v47_v23, 2 }
 0x147   :  { %v49_v25 = vadd.f32 %v48_v24, %v47_v23 }
 0x149   :  { %v50_v26 = vrot.slane %v49_v25, 1 }
 0x14b   :  { %v51_v27 = vadd.f32 %v50_v26, %v49_v25 }
 0x14d   :  { %v53_v28 = vsel %vm52_vm2, %v51_v27, 0.0 }
 0x14e   :  { %54 = vst [vmem:[#allocation2] sm:$0x1] %v53_v28 }
 0x14f   :  { %88 = shalt.err (!%p85_p4)
}
 0x150   :  { %s89_s17 = scalar_lea.hbm %s142_s2, 16 }
 0x151   :  { %p90_p5 = scmp.ne.s32.totalorder %s142_s2, %s89_s17  ;;  %p93_p6 = scmp.lt.u32.totalorder %s89_s17, %s142_s2 }
 0x153   :  { %p95_p7 = pnand %p93_p6, %p90_p5 }
 0x155   :  { %98 = shalt.err (!%p95_p7)
}
 0x156   :  { %64 = dma.vmem_to_hbm [thread:$0]  %s62_s1, 16, %s142_s2, [#allocation3]  }
 0x157   :  { %99 = dma.done.wait [#allocation3], 16  }
 0x158   :  { %100 = vsyncadd [#allocation3], 4294967280 }
 0x159   :  { %68 = vsyncpa [#allocation3], 1 }

</bundles_post_ra>
